<compile_context>
chip_gen: v7x
topology: tpu7x:2x2x1
jax: 0.10.0
libtpu: 0.0.40
codegen_flags: <defaults>
</compile_context>

<pallas_src>
import functools

import jax
import jax.numpy as jnp
from jax.experimental import pallas as pl
from jax.experimental.pallas import tpu as pltpu

LANE = 128
BLOCK_ROWS = 1024   # (1024, 128) f32 tile = 512 KiB; near-roofline, VMEM-safe everywhere.


def _num_tensorcores():
    """TensorCores per chip: 2 on v7x, 1 on v5e/v6e (and on unknown backends)."""
    try:
        kind = jax.devices()[0].device_kind.lower()
    except Exception:
        return 1
    return 2 if "v7" in kind else 1


def _make_in_spec(num_shards, index_map):
    # On v7x (2 shards) the two TensorCores contend for HBM; a 3-deep pipeline
    # smooths DMA arrival jitter.  Fall back silently if this JAX build lacks
    # the pipeline_mode kwarg.
    if num_shards >= 2:
        try:
            return pl.BlockSpec((BLOCK_ROWS, LANE), index_map,
                                pipeline_mode=pl.Buffered(3))
        except (TypeError, AttributeError):
            pass
    return pl.BlockSpec((BLOCK_ROWS, LANE), index_map)


def _iou_kernel(pred_ref, targ_ref, out_ref, acc_ref, *, n_rows, blocks_per_shard):
    c = pl.program_id(0)   # shard (TensorCore) index
    j = pl.program_id(1)   # reduction step within the shard

    @pl.when(j == 0)
    def _init():
        acc_ref[...] = jnp.zeros_like(acc_ref)

    # Rows this logical block is supposed to cover.  The index_map clamps the
    # DMA to a valid block, so anything past `n_rows` (partial tail block, or
    # a fully out-of-range block of the last shard) is garbage and must be
    # masked to contribute zero.
    start_row = (c * blocks_per_shard + j) * BLOCK_ROWS
    rows_left = n_rows - start_row

    def _accumulate(p, t):
        # Lane-parallel partial sums (sublane reduction only); the cross-lane
        # reduction happens once per shard in _finalize.
        acc_ref[0:1, :] += jnp.sum(p * t, axis=0, keepdims=True)
        acc_ref[1:2, :] += jnp.sum(p, axis=0, keepdims=True)
        acc_ref[2:3, :] += jnp.sum(t, axis=0, keepdims=True)

    # Fast path: full blocks do no masking at all.
    @pl.when(rows_left >= BLOCK_ROWS)
    def _full_block():
        _accumulate(pred_ref[...].astype(jnp.float32),
                    targ_ref[...].astype(jnp.float32))

    # Tail path: at most one block per shard pays for iota + cmp + selects.
    @pl.when(rows_left < BLOCK_ROWS)
    def _tail_block():
        row_ids = jax.lax.broadcasted_iota(jnp.int32, (BLOCK_ROWS, LANE), 0)
        valid = row_ids < rows_left   # rows_left <= 0 -> fully masked block
        _accumulate(jnp.where(valid, pred_ref[...].astype(jnp.float32), 0.0),
                    jnp.where(valid, targ_ref[...].astype(jnp.float32), 0.0))

    @pl.when(j == pl.num_programs(1) - 1)
    def _finalize():
        # Cross-lane (XLU) reduction once per shard; (3, 128) -> (3, 1).
        out_ref[0, :, :] = jnp.sum(acc_ref[...], axis=1, keepdims=True)


def iou_pallas(orig_mask, seg_mask, eps=1e-6):
    """Matches IoU.forward(orig_mask, seg_mask, eps)."""
    preds = seg_mask.reshape(-1)      # preds = seg_mask.view(-1)   (native dtype)
    targets = orig_mask.reshape(-1)   # targets = orig_mask.view(-1)
    n = preds.shape[0]

    rem = n % LANE
    main = n - rem

    # No jnp.pad (which would materialize a full HBM copy of both inputs):
    # the kernel consumes the lane-aligned prefix; the <=127-element remainder
    # is reduced with plain JAX here.
    if rem:
        p_tail = preds[main:].astype(jnp.float32)
        t_tail = targets[main:].astype(jnp.float32)
        tail = jnp.stack([jnp.sum(p_tail * t_tail), jnp.sum(p_tail), jnp.sum(t_tail)])
    else:
        tail = jnp.zeros((3,), jnp.float32)

    if main == 0:
        sums = tail
    else:
        n_rows = main // LANE
        preds2d = preds[:main].reshape(n_rows, LANE)
        targets2d = targets[:main].reshape(n_rows, LANE)

        n_blocks = pl.cdiv(n_rows, BLOCK_ROWS)
        # 2 shards only where there are 2 TensorCores (v7x); on v5e/v6e a
        # second shard is just a serial loop plus a wasted clamped block.
        num_shards = min(_num_tensorcores(), n_blocks)
        blocks_per_shard = pl.cdiv(n_blocks, num_shards)

        def in_index(c, j):
            blk = c * blocks_per_shard + j
            # Clamp to a valid block; over-runs are fully masked in-kernel.
            return (jnp.minimum(blk, n_blocks - 1), 0)

        kernel = functools.partial(
            _iou_kernel, n_rows=n_rows, blocks_per_shard=blocks_per_shard)

        partials = pl.pallas_call(
            kernel,
            out_shape=jax.ShapeDtypeStruct((num_shards, 3, 1), jnp.float32),
            grid_spec=pltpu.PrefetchScalarGridSpec(
                num_scalar_prefetch=0,
                grid=(num_shards, blocks_per_shard),
                in_specs=[
                    _make_in_spec(num_shards, in_index),  # preds
                    _make_in_spec(num_shards, in_index),  # targets
                ],
                out_specs=pl.BlockSpec((1, 3, 1), lambda c, j: (c, 0, 0)),
                scratch_shapes=[
                    pltpu.VMEM((3, LANE), jnp.float32),  # [sum(p*t); sum(p); sum(t)]
                ],
            ),
            compiler_params=pltpu.CompilerParams(
                dimension_semantics=("parallel", "arbitrary")),
        )(preds2d, targets2d)

        # TODO(synk): for extremely large masks (~2^31 elems) switch to
        # pairwise/per-chunk accumulation; sequential f32 adds can drift.
        sums = jnp.sum(partials, axis=(0, 2)) + tail   # (3,) = [inter, sum_p, sum_t]

    inter = sums[0]
    union = sums[1] + sums[2] - inter
    return inter / (union + eps)


def iou_reference(orig_mask, seg_mask, eps=1e-6):
    preds = seg_mask.reshape(-1).astype(jnp.float32)
    targets = orig_mask.reshape(-1).astype(jnp.float32)
    intersection = jnp.sum(preds * targets)
    union = jnp.sum(preds) + jnp.sum(targets) - intersection
    return intersection / (union + eps)


if __name__ == "__main__":
    key = jax.random.PRNGKey(0)
    keys = jax.random.split(key, 6)

    # 1) Primary small case: NCHW masks, batch=2, channels=1, 16x16 spatial.
    shape = (2, 1, 16, 16)
    orig_mask = (jax.random.uniform(keys[0], shape) > 0.5).astype(jnp.float32)
    seg_mask = jax.random.uniform(keys[1], shape).astype(jnp.float32)   # soft preds
    iou = iou_pallas(orig_mask, seg_mask)
    jax.block_until_ready(iou)
    ref = iou_reference(orig_mask, seg_mask)
    assert jnp.allclose(iou, ref, atol=1e-5, rtol=1e-4), (iou, ref)

    # 2) Non-lane-aligned shape: exercises the plain-JAX remainder path
    #    (no padding copy) plus the in-kernel tail mask.
    shape2 = (2, 3, 33, 33)
    orig2 = (jax.random.uniform(keys[2], shape2) > 0.5).astype(jnp.float32)
    seg2 = jax.random.uniform(keys[3], shape2).astype(jnp.float32)
    iou2 = iou_pallas(orig2, seg2)
    jax.block_until_ready(iou2)
    ref2 = iou_reference(orig2, seg2)
    assert jnp.allclose(iou2, ref2, atol=1e-5, rtol=1e-4), (iou2, ref2)

    # 3) Multi-block case: exercises the unmasked fast path, accumulation
    #    across grid steps, and both shards on v7x.
    shape3 = (4, 1, 192, 192)   # 147456 elems -> 1152 rows -> 2 blocks
    orig3 = (jax.random.uniform(keys[4], shape3) > 0.5).astype(jnp.float32)
    seg3 = jax.random.uniform(keys[5], shape3).astype(jnp.float32)
    iou3 = iou_pallas(orig3, seg3)
    jax.block_until_ready(iou3)
    ref3 = iou_reference(orig3, seg3)
    assert jnp.allclose(iou3, ref3, atol=1e-5, rtol=1e-4), (iou3, ref3)

    print("KERNEL_OK")
</pallas_src>

<mosaic_0001>
module attributes {stable_mosaic.version = 11 : i64} {
  func.func @_iou_kernel(%arg0: i32, %arg1: i32, %arg2: memref<1024x128xf32, #tpu.memory_space<vmem>>, %arg3: memref<1024x128xf32, #tpu.memory_space<vmem>>, %arg4: memref<1x3x1xf32, #tpu.memory_space<vmem>>, %arg5: memref<3x128xf32, #tpu.memory_space<vmem>>) attributes {dimension_semantics = [#tpu.dimension_semantics<parallel>, #tpu.dimension_semantics<arbitrary>], iteration_bounds = array<i64: 1, 1>, scalar_prefetch = 0 : i64, scratch_operands = 1 : i64, tpu.core_type = #tpu.core_type<tc>, window_params = [{transform_indices = @transform_0, window_bounds = array<i64: 1024, 128>}, {transform_indices = @transform_1, window_bounds = array<i64: 1024, 128>}, {transform_indices = @transform_2, window_bounds = array<i64: 1, 3, 1>}]} {
    %c0_i32 = arith.constant 0 : i32
    %0 = arith.cmpi eq, %arg1, %c0_i32 : i32
    %1 = arith.extui %0 : i1 to i32
    %c0_i32_0 = arith.constant 0 : i32
    %2 = arith.cmpi ne, %1, %c0_i32_0 : i32
    scf.if %2 {
      %cst = arith.constant 0.000000e+00 : f32
      %16 = vector.broadcast %cst : f32 to vector<3x128xf32>
      %c0 = arith.constant 0 : index
      %c0_7 = arith.constant 0 : index
      %17 = vector.load %arg5[%c0, %c0_7] : memref<3x128xf32, #tpu.memory_space<vmem>>, vector<3x128xf32>
      tpu.vector_store %arg5[%c0, %c0_7], %16 {strides = array<i32>} : memref<3x128xf32, #tpu.memory_space<vmem>>, vector<3x128xf32>,
    } else {
    }
    %c1_i32 = arith.constant 1 : i32
    %3 = arith.muli %arg0, %c1_i32 : i32
    %4 = arith.addi %3, %arg1 : i32
    %c1024_i32 = arith.constant 1024 : i32
    %5 = arith.muli %4, %c1024_i32 : i32
    %c4_i32 = arith.constant 4 : i32
    %6 = arith.subi %c4_i32, %5 : i32
    %c1024_i32_1 = arith.constant 1024 : i32
    %7 = arith.cmpi sge, %6, %c1024_i32_1 : i32
    %8 = arith.extui %7 : i1 to i32
    %c0_i32_2 = arith.constant 0 : i32
    %9 = arith.cmpi ne, %8, %c0_i32_2 : i32
    scf.if %9 {
      %c0 = arith.constant 0 : index
      %c0_7 = arith.constant 0 : index
      %16 = vector.load %arg2[%c0, %c0_7] : memref<1024x128xf32, #tpu.memory_space<vmem>>, vector<1024x128xf32>
      %c0_8 = arith.constant 0 : index
      %c0_9 = arith.constant 0 : index
      %17 = vector.load %arg3[%c0_8, %c0_9] : memref<1024x128xf32, #tpu.memory_space<vmem>>, vector<1024x128xf32>
      %c0_10 = arith.constant 0 : index
      %c0_11 = arith.constant 0 : index
      %18 = vector.load %arg5[%c0_10, %c0_11] : memref<3x128xf32, #tpu.memory_space<vmem>>, vector<1x128xf32>
      %19 = arith.mulf %16, %17 : vector<1024x128xf32>
      %cst = arith.constant dense<0.000000e+00> : vector<128xf32>
      %20 = vector.multi_reduction <add>, %19, %cst [0] : vector<1024x128xf32> to vector<128xf32>
      %21 = vector.shape_cast %20 : vector<128xf32> to vector<1x128xf32>
      %22 = arith.addf %18, %21 : vector<1x128xf32>
      %c0_12 = arith.constant 0 : index
      %c0_13 = arith.constant 0 : index
      %23 = vector.load %arg5[%c0_12, %c0_13] : memref<3x128xf32, #tpu.memory_space<vmem>>, vector<1x128xf32>
      tpu.vector_store %arg5[%c0_12, %c0_13], %22 {strides = array<i32>} : memref<3x128xf32, #tpu.memory_space<vmem>>, vector<1x128xf32>,
      %c1 = arith.constant 1 : index
      %c0_14 = arith.constant 0 : index
      %24 = vector.load %arg5[%c1, %c0_14] : memref<3x128xf32, #tpu.memory_space<vmem>>, vector<1x128xf32>
      %cst_15 = arith.constant dense<0.000000e+00> : vector<128xf32>
      %25 = vector.multi_reduction <add>, %16, %cst_15 [0] : vector<1024x128xf32> to vector<128xf32>
      %26 = vector.shape_cast %25 : vector<128xf32> to vector<1x128xf32>
      %27 = arith.addf %24, %26 : vector<1x128xf32>
      %c1_16 = arith.constant 1 : index
      %c0_17 = arith.constant 0 : index
      %28 = vector.load %arg5[%c1_16, %c0_17] : memref<3x128xf32, #tpu.memory_space<vmem>>, vector<1x128xf32>
      tpu.vector_store %arg5[%c1_16, %c0_17], %27 {strides = array<i32>} : memref<3x128xf32, #tpu.memory_space<vmem>>, vector<1x128xf32>,
      %c2 = arith.constant 2 : index
      %c0_18 = arith.constant 0 : index
      %29 = vector.load %arg5[%c2, %c0_18] : memref<3x128xf32, #tpu.memory_space<vmem>>, vector<1x128xf32>
      %cst_19 = arith.constant dense<0.000000e+00> : vector<128xf32>
      %30 = vector.multi_reduction <add>, %17, %cst_19 [0] : vector<1024x128xf32> to vector<128xf32>
      %31 = vector.shape_cast %30 : vector<128xf32> to vector<1x128xf32>
      %32 = arith.addf %29, %31 : vector<1x128xf32>
      %c2_20 = arith.constant 2 : index
      %c0_21 = arith.constant 0 : index
      %33 = vector.load %arg5[%c2_20, %c0_21] : memref<3x128xf32, #tpu.memory_space<vmem>>, vector<1x128xf32>
      tpu.vector_store %arg5[%c2_20, %c0_21], %32 {strides = array<i32>} : memref<3x128xf32, #tpu.memory_space<vmem>>, vector<1x128xf32>,
    } else {
    }
    %c1024_i32_3 = arith.constant 1024 : i32
    %10 = arith.cmpi slt, %6, %c1024_i32_3 : i32
    %11 = arith.extui %10 : i1 to i32
    %c0_i32_4 = arith.constant 0 : i32
    %12 = arith.cmpi ne, %11, %c0_i32_4 : i32
    scf.if %12 {
      %16 = tpu.iota {dimensions = array<i32: 0>} : vector<1024x128xi32>
      %17 = vector.broadcast %6 : i32 to vector<1024x128xi32>
      %18 = arith.cmpi slt, %16, %17 : vector<1024x128xi32>
      %c0 = arith.constant 0 : index
      %c0_7 = arith.constant 0 : index
      %19 = vector.load %arg2[%c0, %c0_7] : memref<1024x128xf32, #tpu.memory_space<vmem>>, vector<1024x128xf32>
      %cst = arith.constant 0.000000e+00 : f32
      %20 = vector.broadcast %cst : f32 to vector<1024x128xf32>
      %21 = arith.select %18, %19, %20 : vector<1024x128xi1>, vector<1024x128xf32>
      %c0_8 = arith.constant 0 : index
      %c0_9 = arith.constant 0 : index
      %22 = vector.load %arg3[%c0_8, %c0_9] : memref<1024x128xf32, #tpu.memory_space<vmem>>, vector<1024x128xf32>
      %cst_10 = arith.constant 0.000000e+00 : f32
      %23 = vector.broadcast %cst_10 : f32 to vector<1024x128xf32>
      %24 = arith.select %18, %22, %23 : vector<1024x128xi1>, vector<1024x128xf32>
      %c0_11 = arith.constant 0 : index
      %c0_12 = arith.constant 0 : index
      %25 = vector.load %arg5[%c0_11, %c0_12] : memref<3x128xf32, #tpu.memory_space<vmem>>, vector<1x128xf32>
      %26 = arith.mulf %21, %24 : vector<1024x128xf32>
      %cst_13 = arith.constant dense<0.000000e+00> : vector<128xf32>
      %27 = vector.multi_reduction <add>, %26, %cst_13 [0] : vector<1024x128xf32> to vector<128xf32>
      %28 = vector.shape_cast %27 : vector<128xf32> to vector<1x128xf32>
      %29 = arith.addf %25, %28 : vector<1x128xf32>
      %c0_14 = arith.constant 0 : index
      %c0_15 = arith.constant 0 : index
      %30 = vector.load %arg5[%c0_14, %c0_15] : memref<3x128xf32, #tpu.memory_space<vmem>>, vector<1x128xf32>
      tpu.vector_store %arg5[%c0_14, %c0_15], %29 {strides = array<i32>} : memref<3x128xf32, #tpu.memory_space<vmem>>, vector<1x128xf32>,
      %c1 = arith.constant 1 : index
      %c0_16 = arith.constant 0 : index
      %31 = vector.load %arg5[%c1, %c0_16] : memref<3x128xf32, #tpu.memory_space<vmem>>, vector<1x128xf32>
      %cst_17 = arith.constant dense<0.000000e+00> : vector<128xf32>
      %32 = vector.multi_reduction <add>, %21, %cst_17 [0] : vector<1024x128xf32> to vector<128xf32>
      %33 = vector.shape_cast %32 : vector<128xf32> to vector<1x128xf32>
      %34 = arith.addf %31, %33 : vector<1x128xf32>
      %c1_18 = arith.constant 1 : index
      %c0_19 = arith.constant 0 : index
      %35 = vector.load %arg5[%c1_18, %c0_19] : memref<3x128xf32, #tpu.memory_space<vmem>>, vector<1x128xf32>
      tpu.vector_store %arg5[%c1_18, %c0_19], %34 {strides = array<i32>} : memref<3x128xf32, #tpu.memory_space<vmem>>, vector<1x128xf32>,
      %c2 = arith.constant 2 : index
      %c0_20 = arith.constant 0 : index
      %36 = vector.load %arg5[%c2, %c0_20] : memref<3x128xf32, #tpu.memory_space<vmem>>, vector<1x128xf32>
      %cst_21 = arith.constant dense<0.000000e+00> : vector<128xf32>
      %37 = vector.multi_reduction <add>, %24, %cst_21 [0] : vector<1024x128xf32> to vector<128xf32>
      %38 = vector.shape_cast %37 : vector<128xf32> to vector<1x128xf32>
      %39 = arith.addf %36, %38 : vector<1x128xf32>
      %c2_22 = arith.constant 2 : index
      %c0_23 = arith.constant 0 : index
      %40 = vector.load %arg5[%c2_22, %c0_23] : memref<3x128xf32, #tpu.memory_space<vmem>>, vector<1x128xf32>
      tpu.vector_store %arg5[%c2_22, %c0_23], %39 {strides = array<i32>} : memref<3x128xf32, #tpu.memory_space<vmem>>, vector<1x128xf32>,
    } else {
    }
    %c0_i32_5 = arith.constant 0 : i32
    %13 = arith.cmpi eq, %arg1, %c0_i32_5 : i32
    %14 = arith.extui %13 : i1 to i32
    %c0_i32_6 = arith.constant 0 : i32
    %15 = arith.cmpi ne, %14, %c0_i32_6 : i32
    scf.if %15 {
      %c0 = arith.constant 0 : index
      %c0_7 = arith.constant 0 : index
      %16 = vector.load %arg5[%c0, %c0_7] : memref<3x128xf32, #tpu.memory_space<vmem>>, vector<3x128xf32>
      %cst = arith.constant dense<0.000000e+00> : vector<3xf32>
      %17 = vector.multi_reduction <add>, %16, %cst [1] : vector<3x128xf32> to vector<3xf32>
      %18 = vector.shape_cast %17 : vector<3xf32> to vector<3x1xf32>
      %c0_8 = arith.constant 0 : index
      %c0_9 = arith.constant 0 : index
      %c0_10 = arith.constant 0 : index
      %19 = vector.load %arg4[%c0_8, %c0_9, %c0_10] : memref<1x3x1xf32, #tpu.memory_space<vmem>>, vector<1x3x1xf32>
      %20 = vector.shape_cast %19 : vector<1x3x1xf32> to vector<3x1xf32>
      %21 = vector.shape_cast %18 : vector<3x1xf32> to vector<1x3x1xf32>
      tpu.vector_store %arg4[%c0_8, %c0_9, %c0_10], %21 {strides = array<i32>} : memref<1x3x1xf32, #tpu.memory_space<vmem>>, vector<1x3x1xf32>,
    } else {
    }
    return
  }
  func.func @transform_0(%arg0: i32, %arg1: i32) -> (i32, i32) {
    %c1_i32 = arith.constant 1 : i32
    %0 = arith.muli %arg0, %c1_i32 : i32
    %1 = arith.addi %0, %arg1 : i32
    %c0_i32 = arith.constant 0 : i32
    %2 = arith.minsi %1, %c0_i32 : i32
    %c0_i32_0 = arith.constant 0 : i32
    %c0_i32_1 = arith.constant 0 : i32
    return %2, %c0_i32_0 : i32, i32
  }
  func.func @transform_1(%arg0: i32, %arg1: i32) -> (i32, i32) {
    %c1_i32 = arith.constant 1 : i32
    %0 = arith.muli %arg0, %c1_i32 : i32
    %1 = arith.addi %0, %arg1 : i32
    %c0_i32 = arith.constant 0 : i32
    %2 = arith.minsi %1, %c0_i32 : i32
    %c0_i32_0 = arith.constant 0 : i32
    %c0_i32_1 = arith.constant 0 : i32
    return %2, %c0_i32_0 : i32, i32
  }
  func.func @transform_2(%arg0: i32, %arg1: i32) -> (i32, i32, i32) {
    %c0_i32 = arith.constant 0 : i32
    %c0_i32_0 = arith.constant 0 : i32
    %c0_i32_1 = arith.constant 0 : i32
    return %arg0, %c0_i32, %c0_i32_0 : i32, i32, i32
  }
}

</mosaic_0001>

<bundles_post_ra>
// kernel: tpu_custom_call.1
= control target key start
LH: loop header
LB: loop body
LE: loop exit
PB: predicated region body
PF: predicated region fallthrough
CT: control target
= control target key end

     0   :  { %7 = vsyncpa [#allocation4], 0  ;;  %s2305_s0 = inlined_call_operand.hbm [shape: f32[4,128], index: 0, kind: input, shape index: {}]   ;;  %s2306_s1 = inlined_call_operand.hbm [shape: f32[4,128], index: 1, kind: input, shape index: {}]   ;;  %s2307_s2 = inlined_call_operand.vmem [shape: f32[1,3,1], index: 2, kind: output, shape index: {}]  }
   0x1   :  { %8 = vsyncpa [#allocation6], 0 }
   0x2   :  { %19 = vsyncadd [#allocation4], 16320  ;;  %s2258_s9 = smov [#allocation3]   ;;  %s2210_s13 = scalar_lea.hbm %s2305_s0, 64 }
   0x3   :  { %s24_s10 = sshll.u32 %s2258_s9, 4  ;;  %p2211_p0 = scmp.ne.s32.totalorder %s2305_s0, %s2210_s13  ;;  %s25_s10 = int_to_ptr.vmem [resolvable:$true] %s24_s10 }
   0x4   :  { %p2214_p1 = scmp.lt.u32.totalorder %s2210_s13, %s2305_s0 }
   0x6   :  { %p2216_p2 = pnand %p2214_p1, %p2211_p0 }
   0x8   :  { %2219 = shalt.err (!%p2216_p2)
}
   0x9   :  { %s2220_s18 = scalar_lea.vmem %s25_s10, 64  ;;  %s2224_s19 = scalar_lea.vmem %s25_s10, 16384 }
   0xa   :  { %p2221_p3 = scmp.ne.s32.totalorder %s25_s10, %s2220_s18  ;;  %p2225_p4 = scmp.lt.s32.totalorder %s25_s10, %s25_s10 }
   0xb   :  { %p2226_p5 = scmp.lt.s32.totalorder %s2224_s19, %s2220_s18 }
   0xd   :  { %p2227_p6 = por %p2226_p5, %p2225_p4 }
   0xf   :  { %p2228_p7 = pnand %p2227_p6, %p2221_p3 }
  0x11   :  { %2231 = shalt.err (!%p2228_p7)
}
  0x12   :  { %s2259_s20 = smov 64   ;;  %s2260_s21 = smov 4  }
  0x13   :  { %30 = dma.hbm_to_vmem [thread:$0]  %s2305_s0, 64, %s25_s10, [#allocation4], %s2259_s20, %s2259_s20, %s2260_s21  }
  0x14   :  { %41 = vsyncadd [#allocation6], 16320  ;;  %s2261_s24 = smov [#allocation5]   ;;  %s2232_s28 = scalar_lea.hbm %s2306_s1, 64 }
  0x15   :  { %s46_s25 = sshll.u32 %s2261_s24, 4  ;;  %p2233_p8 = scmp.ne.s32.totalorder %s2306_s1, %s2232_s28  ;;  %s47_s25 = int_to_ptr.vmem [resolvable:$true] %s46_s25 }
  0x16   :  { %p2236_p9 = scmp.lt.u32.totalorder %s2232_s28, %s2306_s1 }
  0x18   :  { %p2238_p10 = pnand %p2236_p9, %p2233_p8 }
  0x1a   :  { %2241 = shalt.err (!%p2238_p10)
}
  0x1b   :  { %s2242_s5 = scalar_lea.vmem %s47_s25, 64  ;;  %s2246_s0 = scalar_lea.vmem %s47_s25, 16384 }
  0x1c   :  { %p2243_p11 = scmp.ne.s32.totalorder %s47_s25, %s2242_s5  ;;  %p2247_p12 = scmp.lt.s32.totalorder %s47_s25, %s47_s25 }
  0x1d   :  { %p2248_p13 = scmp.lt.s32.totalorder %s2246_s0, %s2242_s5 }
  0x1f   :  { %p2249_p0 = por %p2248_p13, %p2247_p12 }
  0x21   :  { %p2250_p1 = pnand %p2249_p0, %p2243_p11 }
  0x23   :  { %2253 = shalt.err (!%p2250_p1)
}
  0x24   :  { %52 = dma.hbm_to_vmem [thread:$0]  %s2306_s1, 64, %s47_s25, [#allocation6], %s2259_s20, %s2259_s20, %s2260_s21  }
  0x25   :  { %2254 = dma.done.wait [#allocation4], 16384  }
  0x26   :  { %2255 = vsyncadd [#allocation4], 4294950912 }
  0x27   :  { %2256 = dma.done.wait [#allocation6], 16384  }
  0x28   :  { %2257 = vsyncadd [#allocation6], 4294950912  ;;  %v879_v0 = vlaneseq  ;;  %v2262_v1 = vmov 0.0   ;;  %v1137_v3 = vld [vmem:[#allocation3] sm:$0xff]  ;;  %vm2189_vm1 = vcmask 1042432   ;;  %vm2193_vm2 = vcmask 2048  }
  0x29   :  { %75 = vst [vmem:[#allocation2] sm:$0x7] %v2262_v1  ;;  %v1393_v4 = vld [vmem:[#allocation5] sm:$0xff] }
  0x2a   :  { %v880_v2 = vshrl.u32 %v879_v0, 7 }
  0x2c   :  { %vm1009_vm0 = vcmp.lt.s32.totalorder %v880_v2, 4 }
  0x2d   :  { %v1265_v5 = vsel %vm1009_vm0, %v1137_v3, 0.0  ;;  %v1521_v6 = vsel %vm1009_vm0, %v1393_v4, 0.0 }
  0x2e   :  { %v1650_v7 = vmul.f32 %v1521_v6, %v1265_v5  ;;  %v2041_v8 = vrot.slane %v1265_v5, 4  ;;  %v2177_v9 = vrot.slane %v1521_v6, 4 }
  0x30   :  { %v1905_v10 = vrot.slane %v1650_v7, 4  ;;  %v2042_v11 = vadd.f32 %v2041_v8, %v1265_v5  ;;  %v2178_v12 = vadd.f32 %v2177_v9, %v1521_v6  ;;  %v1913_v22 = vld [vmem:[#allocation2 + $0x1] sm:$0x1]  ;;  %v2049_v23 = vld [vmem:[#allocation2 + $0x2] sm:$0x1] }
  0x31   :  { %v1649_v27 = vld [vmem:[#allocation2] sm:$0x1] }
  0x32   :  { %v1906_v13 = vadd.f32 %v1905_v10, %v1650_v7  ;;  %v2043_v14 = vrot.slane %v2042_v11, 2  ;;  %v2179_v15 = vrot.slane %v2178_v12, 2 }
  0x34   :  { %v1907_v16 = vrot.slane %v1906_v13, 2  ;;  %v2044_v17 = vadd.f32 %v2043_v14, %v2042_v11  ;;  %v2180_v18 = vadd.f32 %v2179_v15, %v2178_v12 }
  0x36   :  { %v1908_v19 = vadd.f32 %v1907_v16, %v1906_v13  ;;  %v2045_v20 = vrot.slane %v2044_v17, 1  ;;  %v2181_v21 = vrot.slane %v2180_v18, 1 }
  0x38   :  { %v1909_v24 = vrot.slane %v1908_v19, 1  ;;  %v2046_v25 = vadd.f32 %v2045_v20, %v2044_v17  ;;  %v2182_v26 = vadd.f32 %v2181_v21, %v2180_v18 }
  0x3a   :  { %v1910_v28 = vadd.f32 %v1909_v24, %v1908_v19  ;;  %v2047_v29 = vadd.f32 %v2046_v25, %v1913_v22  ;;  %v2183_v30 = vadd.f32 %v2182_v26, %v2049_v23 }
  0x3c   :  { %v1911_v31 = vadd.f32 %v1910_v28, %v1649_v27  ;;  %2048 = vst [vmem:[#allocation2 + $0x1] sm:$0x1] %v2047_v29  ;;  %2184 = vst [vmem:[#allocation2 + $0x2] sm:$0x1] %v2183_v30 }
  0x3e   :  { %1912 = vst [vmem:[#allocation2] sm:$0x1] %v1911_v31 }
  0x45   :  { %v2188_v32 = vld [vmem:[#allocation2] sm:$0x7] }
  0x46   :  { %v2190_v33 = vsel %vm2189_vm1, %v2188_v32, 0.0 }
  0x47   :  { %2191 = vadd.xlane.f32.xlu0 %v2190_v33 }
  0xd4   :  { %v2192_v34 = vpop.xlane.xlu0 %2191 }
  0xd5   :  { %2194 = vst.msk [vmem:[%s2307_s2] sm:$0x7] %vm2193_vm2, %v2192_v34 }
  0xd6   :  { %2199 = vsyncpa [#allocation4], 1 }
  0xd7   :  { %2200 = vsyncpa [#allocation6], 1 }

</bundles_post_ra>
